<compile_context>
chip_gen: v7x
topology: tpu7x:2x2x1
jax: 0.10.0
libtpu: 0.0.40
codegen_flags: <defaults>
</compile_context>

<pallas_src>
import functools

import jax
import jax.numpy as jnp
from jax.experimental import pallas as pl
from jax.experimental.pallas import tpu as pltpu


def _sublane_multiple(dtype) -> int:
    # sub-32-bit dtypes pack 2 / 4 rows per sublane
    return {1: 32, 2: 16}.get(jnp.dtype(dtype).itemsize, 8)


def _tap_kernel(x_ref, o_ref, acc_ref, *, inv_t: float, t_total: int,
                tt: int, chunk: int, needs_mask: bool):
    # x_ref:   (tr, tt)     input tile, frames on lanes
    # o_ref:   (tr, 1)      output tile (resident across the time grid axis)
    # acc_ref: (tr, chunk)  f32 lane-resident partial sums
    t = pl.program_id(1)

    @pl.when(t == 0)
    def _init():
        acc_ref[...] = jnp.zeros_like(acc_ref)

    n_chunks = tt // chunk  # static
    if needs_mask:
        lane_idx = jax.lax.broadcasted_iota(jnp.int32, acc_ref.shape, 1)
    t0 = t * tt
    for c in range(n_chunks):  # static, unrolled; one 128-lane slab at a time
        piece = x_ref[:, c * chunk:(c + 1) * chunk].astype(jnp.float32)
        if needs_mask:
            limit = t_total - (t0 + c * chunk)
            piece = jnp.where(lane_idx < limit, piece, 0.0)
        acc_ref[...] += piece  # VPU adds only; no cross-lane work here

    @pl.when(t == pl.num_programs(1) - 1)
    def _finalize():
        # single cross-lane (XLU) reduce per row block, then scale by 1/T
        row_sum = jnp.sum(acc_ref[...], axis=1, keepdims=True)
        o_ref[...] = (row_sum * inv_t).astype(o_ref.dtype)


def temporal_average_pooling(x: jax.Array,
                             *,
                             target_tile_bytes: int = 2 * 1024 * 1024) -> jax.Array:
    """TAP forward: (B, C, T) -> (B, C) = mean over frames."""
    B, C, T = x.shape
    dtype = x.dtype
    itemsize = jnp.dtype(dtype).itemsize
    R = B * C

    # Free, layout-preserving view: frames end up on the lane axis.
    x2 = x.reshape(R, T)

    # ---- time tile (lane axis) ------------------------------------------
    if T <= 128:
        tt = T                                  # full extent: always legal
    else:
        tt = min((T // 128) * 128, 2048)        # 128-multiple, <= T
    chunk = min(tt, 128)
    needs_mask = (T % tt) != 0                  # ragged last time block

    # ---- row tile (sublane axis), dtype-aware ----------------------------
    sm = _sublane_multiple(dtype)
    row_bytes = max(tt * itemsize, 1)
    if R < 8:
        tr = R                                  # full extent for tiny row counts
    else:
        align = sm if R >= sm else 8
        want = max(align, (target_tile_bytes // row_bytes) // align * align)
        tr = min(want, (R // align) * align)
        # v7x: make sure both TensorCores get work when there is enough to split.
        if (R + tr - 1) // tr == 1 and R >= 2 * align:
            tr = ((R // 2 + align - 1) // align) * align

    grid = (pl.cdiv(R, tr), pl.cdiv(T, tt))
    inv_t = 1.0 / float(T)

    kernel = functools.partial(_tap_kernel, inv_t=inv_t, t_total=T, tt=tt,
                               chunk=chunk, needs_mask=needs_mask)

    cost = pl.CostEstimate(
        flops=R * T + R,
        transcendentals=0,
        bytes_accessed=R * T * itemsize + R * itemsize,
    )

    out = pl.pallas_call(
        kernel,
        out_shape=jax.ShapeDtypeStruct((R, 1), dtype),
        grid=grid,
        in_specs=[pl.BlockSpec((tr, tt), lambda r, t: (r, t))],
        out_specs=pl.BlockSpec((tr, 1), lambda r, t: (r, 0)),
        scratch_shapes=[pltpu.VMEM((tr, chunk), jnp.float32)],
        compiler_params=pltpu.CompilerParams(
            dimension_semantics=("parallel", "arbitrary"),
            vmem_limit_bytes=32 * 1024 * 1024,
        ),
        cost_estimate=cost,
    )(x2)

    return out.reshape(B, C)


if __name__ == "__main__":
    key = jax.random.PRNGKey(0)
    B, C, T = 2, 4, 16
    x = jax.random.normal(key, (B, C, T), dtype=jnp.float32)

    out = temporal_average_pooling(x)
    out = jax.block_until_ready(out)

    # correctness check against plain-JAX reference of the PyTorch forward
    ref = jnp.mean(x, axis=-1).reshape(B, -1)
    assert out.shape == (B, C), out.shape
    assert jnp.allclose(out, ref, atol=1e-5), (out, ref)

    print("KERNEL_OK")
</pallas_src>

<mosaic_0001>
module attributes {stable_mosaic.version = 11 : i64} {
  func.func @_tap_kernel(%arg0: i32, %arg1: i32, %arg2: memref<8x16xf32, #tpu.memory_space<vmem>>, %arg3: memref<8x1xf32, #tpu.memory_space<vmem>>, %arg4: memref<8x16xf32, #tpu.memory_space<vmem>>) attributes {dimension_semantics = [#tpu.dimension_semantics<parallel>, #tpu.dimension_semantics<arbitrary>], iteration_bounds = array<i64: 1, 1>, scalar_prefetch = 0 : i64, scratch_operands = 1 : i64, tpu.core_type = #tpu.core_type<tc>, window_params = [{transform_indices = @transform_0, window_bounds = array<i64: 8, 16>}, {transform_indices = @transform_1, window_bounds = array<i64: 8, 1>}]} {
    %c0_i32 = arith.constant 0 : i32
    %0 = arith.cmpi eq, %arg1, %c0_i32 : i32
    %1 = arith.extui %0 : i1 to i32
    %c0_i32_0 = arith.constant 0 : i32
    %2 = arith.cmpi ne, %1, %c0_i32_0 : i32
    scf.if %2 {
      %cst = arith.constant 0.000000e+00 : f32
      %10 = vector.broadcast %cst : f32 to vector<8x16xf32>
      %c0_8 = arith.constant 0 : index
      %c0_9 = arith.constant 0 : index
      %11 = vector.load %arg4[%c0_8, %c0_9] : memref<8x16xf32, #tpu.memory_space<vmem>>, vector<8x16xf32>
      tpu.vector_store %arg4[%c0_8, %c0_9], %10 {strides = array<i32>} : memref<8x16xf32, #tpu.memory_space<vmem>>, vector<8x16xf32>,
    } else {
    }
    %c0 = arith.constant 0 : index
    %c0_1 = arith.constant 0 : index
    %3 = vector.load %arg2[%c0, %c0_1] : memref<8x16xf32, #tpu.memory_space<vmem>>, vector<8x16xf32>
    %c0_2 = arith.constant 0 : index
    %c0_3 = arith.constant 0 : index
    %4 = vector.load %arg4[%c0_2, %c0_3] : memref<8x16xf32, #tpu.memory_space<vmem>>, vector<8x16xf32>
    %5 = arith.addf %4, %3 : vector<8x16xf32>
    %c0_4 = arith.constant 0 : index
    %c0_5 = arith.constant 0 : index
    %6 = vector.load %arg4[%c0_4, %c0_5] : memref<8x16xf32, #tpu.memory_space<vmem>>, vector<8x16xf32>
    tpu.vector_store %arg4[%c0_4, %c0_5], %5 {strides = array<i32>} : memref<8x16xf32, #tpu.memory_space<vmem>>, vector<8x16xf32>,
    %c0_i32_6 = arith.constant 0 : i32
    %7 = arith.cmpi eq, %arg1, %c0_i32_6 : i32
    %8 = arith.extui %7 : i1 to i32
    %c0_i32_7 = arith.constant 0 : i32
    %9 = arith.cmpi ne, %8, %c0_i32_7 : i32
    scf.if %9 {
      %c0_8 = arith.constant 0 : index
      %c0_9 = arith.constant 0 : index
      %10 = vector.load %arg4[%c0_8, %c0_9] : memref<8x16xf32, #tpu.memory_space<vmem>>, vector<8x16xf32>
      %cst = arith.constant dense<0.000000e+00> : vector<8xf32>
      %11 = vector.multi_reduction <add>, %10, %cst [1] : vector<8x16xf32> to vector<8xf32>
      %12 = vector.shape_cast %11 : vector<8xf32> to vector<8x1xf32>
      %cst_10 = arith.constant 6.250000e-02 : f32
      %13 = vector.broadcast %cst_10 : f32 to vector<8x1xf32>
      %14 = arith.mulf %12, %13 : vector<8x1xf32>
      %c0_11 = arith.constant 0 : index
      %c0_12 = arith.constant 0 : index
      %15 = vector.load %arg3[%c0_11, %c0_12] : memref<8x1xf32, #tpu.memory_space<vmem>>, vector<8x1xf32>
      tpu.vector_store %arg3[%c0_11, %c0_12], %14 {strides = array<i32>} : memref<8x1xf32, #tpu.memory_space<vmem>>, vector<8x1xf32>,
    } else {
    }
    return
  }
  func.func @transform_0(%arg0: i32, %arg1: i32) -> (i32, i32) {
    %c0_i32 = arith.constant 0 : i32
    return %arg0, %arg1 : i32, i32
  }
  func.func @transform_1(%arg0: i32, %arg1: i32) -> (i32, i32) {
    %c0_i32 = arith.constant 0 : i32
    %c0_i32_0 = arith.constant 0 : i32
    return %arg0, %c0_i32 : i32, i32
  }
}

</mosaic_0001>

<bundles_post_ra>
// kernel: tpu_custom_call.1
= control target key start
LH: loop header
LB: loop body
LE: loop exit
PB: predicated region body
PF: predicated region fallthrough
CT: control target
= control target key end

     0   :  { %6 = vsyncpa [#allocation4], 0  ;;  %s72_s6 = smov [#allocation3]   ;;  %s99_s0 = inlined_call_operand.hbm [shape: f32[8,16], index: 0, kind: input, shape index: {}]   ;;  %s100_s1 = inlined_call_operand.vmem [shape: f32[8,1], index: 1, kind: output, shape index: {}]  }
   0x1   :  { %s13_s7 = sshll.u32 %s72_s6, 4  ;;  %s48_s10 = scalar_lea.hbm %s99_s0, 128  ;;  %s14_s7 = int_to_ptr.vmem [resolvable:$true] %s13_s7 }
   0x2   :  { %p49_p0 = scmp.ne.s32.totalorder %s99_s0, %s48_s10  ;;  %p52_p1 = scmp.lt.u32.totalorder %s48_s10, %s99_s0 }
   0x4   :  { %p54_p2 = pnand %p52_p1, %p49_p0 }
   0x6   :  { %57 = shalt.err (!%p54_p2)
}
   0x7   :  { %s58_s15 = scalar_lea.vmem %s14_s7, 128  ;;  %p63_p4 = scmp.lt.s32.totalorder %s14_s7, %s14_s7 }
   0x8   :  { %p59_p3 = scmp.ne.s32.totalorder %s14_s7, %s58_s15  ;;  %p64_p5 = scmp.lt.s32.totalorder %s58_s15, %s58_s15 }
   0xa   :  { %p65_p6 = por %p64_p5, %p63_p4 }
   0xc   :  { %p66_p7 = pnand %p65_p6, %p59_p3 }
   0xe   :  { %69 = shalt.err (!%p66_p7)
}
   0xf   :  { %16 = dma.hbm_to_vmem [thread:$0]  %s99_s0, 128, %s14_s7, [#allocation4]  }
  0x10   :  { %70 = dma.done.wait [#allocation4], 128  }
  0x11   :  { %71 = vsyncadd [#allocation4], 4294967168  ;;  %vm24_vm0 = vcmask 130048   ;;  %v73_v0 = vmov 0.0   ;;  %v26_v1 = vld [vmem:[#allocation3] sm:$0xff]  ;;  %vm39_vm1 = vcmask 7168  }
  0x12   :  { %25 = vst.msk [vmem:[#allocation2] sm:$0xff] %vm24_vm0, %v73_v0 }
  0x19   :  { %v27_v2 = vld [vmem:[#allocation2] sm:$0xff] }
  0x1a   :  { %v28_v3 = vadd.f32 %v27_v2, %v26_v1 }
  0x1c   :  { %30 = vst.msk [vmem:[#allocation2] sm:$0xff] %vm24_vm0, %v28_v3 }
  0x23   :  { %v34_v4 = vld [vmem:[#allocation2] sm:$0xff] }
  0x24   :  { %v35_v5 = vsel %vm24_vm0, %v34_v4, 0.0 }
  0x25   :  { %36 = vadd.xlane.f32.xlu0 %v35_v5 }
  0xb2   :  { %v37_v6 = vpop.xlane.xlu0 %36 }
  0xb3   :  { %v38_v7 = vmul.f32 0.0625, %v37_v6 }
  0xb5   :  { %40 = vst.msk [vmem:[%s100_s1] sm:$0xff] %vm39_vm1, %v38_v7 }
  0xb6   :  { %45 = vsyncpa [#allocation4], 1 }

</bundles_post_ra>
